<compile_context>
chip_gen: v5e
topology: v5e:2x2
jax: 0.10.0
libtpu: 0.0.40
codegen_flags: <defaults>
</compile_context>

<pallas_src>
import math
import functools

import jax
import jax.numpy as jnp
from jax import lax
from jax.experimental import pallas as pl
from jax.experimental.pallas import tpu as pltpu


def build_pe(seq_len: int, d_model: int) -> jnp.ndarray:
    """Replicates the PyTorch buffer construction exactly (float32)."""
    position = jnp.arange(0, seq_len, dtype=jnp.float32)[:, None]           # (S, 1)
    div_term = jnp.exp(
        jnp.arange(0, d_model, 2, dtype=jnp.float32) * (-math.log(10000.0) / d_model)
    )                                                                        # (D/2,)
    angles = position * div_term                                             # (S, D/2)
    pe = jnp.zeros((seq_len, d_model), dtype=jnp.float32)
    pe = pe.at[:, 0::2].set(jnp.sin(angles))
    pe = pe.at[:, 1::2].set(jnp.cos(angles))
    return pe                                                                # (S, D)


def _pe_dropout_kernel(seed_ref, x_ref, pe_ref, o_ref, *,
                       p: float, training: bool, n_lanes: int):
    # x_ref: (bB, tC), pe_ref: (1, tC) (broadcast over rows), o_ref: (bB, tC)
    y = x_ref[...] + pe_ref[...]
    if training and p > 0.0:
        if p >= 1.0:
            y = jnp.zeros_like(y)
        else:
            bB, tC = x_ref.shape
            row0 = pl.program_id(0) * bB
            col0 = pl.program_id(1) * tC
            rows = lax.broadcasted_iota(jnp.int32, (bB, tC), 0) + row0
            cols = lax.broadcasted_iota(jnp.int32, (bB, tC), 1) + col0
            idx = (rows * n_lanes + cols).astype(jnp.uint32)
            seed = seed_ref[0].astype(jnp.uint32)
            # Counter-based hash PRNG (lowbias32-style finalizer), seed mixed in.
            # TODO(synk): not bit-identical to torch's dropout RNG stream, only
            # statistically equivalent.
            h = idx * jnp.uint32(0x9E3779B9) + seed * jnp.uint32(0x85EBCA6B)
            h = h ^ (h >> 16)
            h = h * jnp.uint32(0x7FEB352D)
            h = h ^ (h >> 15)
            h = h * jnp.uint32(0x846CA68B)
            h = h ^ (h >> 16)
            # Top 24 bits as a signed int -> exact integer threshold compare.
            r24 = (h >> 8).astype(jnp.int32)                     # [0, 2^24)
            thresh = jnp.int32(int(round(p * (1 << 24))))
            keep = r24 >= thresh                                  # P(keep) = 1 - p
            y = jnp.where(keep, y * jnp.float32(1.0 / (1.0 - p)), jnp.float32(0.0))
    o_ref[...] = y.astype(o_ref.dtype)


def positional_encoding(x, pe, *, p: float = 0.1, training: bool = False,
                        seed: int = 0, max_tile_bytes: int = 2 * 1024 * 1024):
    """x: (B, S, D); pe: (S_full, D) with S_full >= S.  Returns (B, S, D)."""
    B, S, D = x.shape
    N = S * D
    itemsize = jnp.dtype(x.dtype).itemsize

    # Lane-dense, elementwise-friendly 2-D layout (pure layout plumbing).
    x2 = x.reshape(B, N)
    pe2 = pe[:S, :].reshape(1, N).astype(x.dtype)

    # --- tile selection: ~max_tile_bytes per block, (8,128)-legal shapes ---
    budget_elems = max(1024, max_tile_bytes // itemsize)
    if N <= budget_elems:
        tC = N                                           # full lane extent
        rows_budget = max(1, budget_elems // N)
        if B <= rows_budget:
            bB = B                                       # full batch extent
        else:
            bB = max(8, (rows_budget // 8) * 8)          # multiple of 8 sublanes
    else:
        bB = B if B <= 8 else 8
        tC = max(128, (budget_elems // bB // 128) * 128)  # multiple of 128 lanes

    grid = (pl.cdiv(B, bB), pl.cdiv(N, tC))

    tile_bytes = bB * tC * itemsize
    pe_bytes = tC * itemsize
    # double-buffered x + out tiles + pe tiles, plus slack; clamp to sane range.
    vmem_limit = int(min(48 * 1024 * 1024,
                         max(4 * 1024 * 1024, 5 * tile_bytes + 2 * pe_bytes)))

    kernel = functools.partial(_pe_dropout_kernel, p=p, training=training, n_lanes=N)
    seed_arr = jnp.array([seed], dtype=jnp.int32)

    out2 = pl.pallas_call(
        kernel,
        out_shape=jax.ShapeDtypeStruct((B, N), x.dtype),
        grid_spec=pltpu.PrefetchScalarGridSpec(
            num_scalar_prefetch=1,
            grid=grid,
            in_specs=[
                pl.BlockSpec((bB, tC), lambda b, c, seed: (b, c)),   # x tile
                pl.BlockSpec((1, tC), lambda b, c, seed: (0, c)),    # pe tile
            ],
            out_specs=pl.BlockSpec((bB, tC), lambda b, c, seed: (b, c)),
        ),
        compiler_params=pltpu.CompilerParams(
            dimension_semantics=("parallel", "parallel"),
            vmem_limit_bytes=vmem_limit,
        ),
        cost_estimate=pl.CostEstimate(
            flops=B * N,                                  # one add per element
            transcendentals=0,
            bytes_accessed=(2 * B * N + N) * itemsize,
        ),
    )(seed_arr, x2, pe2)

    return out2.reshape(B, S, D)


if __name__ == "__main__":
    # Module hyperparameters (deterministic, in-script).
    d_model = 32
    seq_len = 8
    dropout_p = 0.1
    batch = 2

    pe = build_pe(seq_len, d_model)

    key = jax.random.PRNGKey(0)
    x = jax.random.normal(key, (batch, seq_len, d_model), dtype=jnp.float32)

    # Eval-mode forward (dropout is identity): bit-exact check vs reference.
    y_eval = positional_encoding(x, pe, p=dropout_p, training=False)
    y_eval = jax.block_until_ready(y_eval)
    ref = x + pe[None, :seq_len, :]
    assert jnp.allclose(y_eval, ref, atol=1e-6), "eval-mode mismatch"

    # Training-mode forward (in-kernel stateless-hash dropout).
    y_train = positional_encoding(x, pe, p=dropout_p, training=True, seed=123)
    y_train = jax.block_until_ready(y_train)
    assert y_train.shape == (batch, seq_len, d_model)
    # Every surviving element must equal (x + pe) / (1 - p); dropped ones are 0.
    scaled = ref / (1.0 - dropout_p)
    dropped = (y_train == 0.0)
    assert jnp.allclose(jnp.where(dropped, 0.0, y_train),
                        jnp.where(dropped, 0.0, scaled), atol=1e-5), "train-mode mismatch"

    print("KERNEL_OK")
</pallas_src>

<mosaic_0001>
module attributes {stable_mosaic.version = 11 : i64} {
  func.func @_pe_dropout_kernel(%arg0: i32, %arg1: i32, %arg2: memref<1xi32, #tpu.memory_space<smem>>, %arg3: memref<2x256xf32, #tpu.memory_space<vmem>>, %arg4: memref<1x256xf32, #tpu.memory_space<vmem>>, %arg5: memref<2x256xf32, #tpu.memory_space<vmem>>) attributes {dimension_semantics = [#tpu.dimension_semantics<parallel>, #tpu.dimension_semantics<parallel>], iteration_bounds = array<i64: 1, 1>, scalar_prefetch = 1 : i64, scratch_operands = 0 : i64, tpu.core_type = #tpu.core_type<tc>, window_params = [{transform_indices = @transform_0, window_bounds = array<i64: 2, 256>}, {transform_indices = @transform_1, window_bounds = array<i64: 1, 256>}, {transform_indices = @transform_2, window_bounds = array<i64: 2, 256>}]} {
    %c0 = arith.constant 0 : index
    %c0_0 = arith.constant 0 : index
    %0 = vector.load %arg3[%c0, %c0_0] : memref<2x256xf32, #tpu.memory_space<vmem>>, vector<2x256xf32>
    %c0_1 = arith.constant 0 : index
    %c0_2 = arith.constant 0 : index
    %1 = vector.load %arg4[%c0_1, %c0_2] : memref<1x256xf32, #tpu.memory_space<vmem>>, vector<1x256xf32>
    %2 = vector.broadcast %1 : vector<1x256xf32> to vector<2x256xf32>
    %3 = arith.addf %0, %2 : vector<2x256xf32>
    %c0_3 = arith.constant 0 : index
    %c0_4 = arith.constant 0 : index
    %4 = vector.load %arg5[%c0_3, %c0_4] : memref<2x256xf32, #tpu.memory_space<vmem>>, vector<2x256xf32>
    tpu.vector_store %arg5[%c0_3, %c0_4], %3 {strides = array<i32>} : memref<2x256xf32, #tpu.memory_space<vmem>>, vector<2x256xf32>,
    return
  }
  func.func @transform_0(%arg0: i32, %arg1: i32, %arg2: memref<1xi32, #tpu.memory_space<smem>>) -> (i32, i32) {
    %c0_i32 = arith.constant 0 : i32
    return %arg0, %arg1 : i32, i32
  }
  func.func @transform_1(%arg0: i32, %arg1: i32, %arg2: memref<1xi32, #tpu.memory_space<smem>>) -> (i32, i32) {
    %c0_i32 = arith.constant 0 : i32
    %c0_i32_0 = arith.constant 0 : i32
    return %c0_i32, %arg1 : i32, i32
  }
  func.func @transform_2(%arg0: i32, %arg1: i32, %arg2: memref<1xi32, #tpu.memory_space<smem>>) -> (i32, i32) {
    %c0_i32 = arith.constant 0 : i32
    return %arg0, %arg1 : i32, i32
  }
}

</mosaic_0001>

<bundles_post_ra>
// kernel: tpu_custom_call.1
= control target key start
LH: loop header
LB: loop body
LE: loop exit
PB: predicated region body
PF: predicated region fallthrough
CT: control target
= control target key end

     0   :  { %9 = vsyncpa [#allocation5], 0  ;;  %s141_s0 = inlined_call_operand.<no memory space> [shape: s32[1], index: 0, kind: input, shape index: {}]   ;;  %s142_s1 = inlined_call_operand.hbm [shape: f32[2,256], index: 1, kind: input, shape index: {}]   ;;  %s143_s2 = inlined_call_operand.vmem [shape: f32[1,256], index: 2, kind: input, shape index: {}]   ;;  %s144_s3 = inlined_call_operand.hbm [shape: f32[2,256], index: 3, kind: output, shape index: {}]  }
   0x1   :  { %10 = vsyncpa [#allocation6], 0  ;;  %s16_s14 = sshll.u32 %s142_s1, 4  ;;  %s110_s15 = smov [#allocation4]   ;;  %s17_s14 = int_to_ptr.hbm [resolvable:$true] %s16_s14 }
   0x2   :  { %s18_s16 = sshll.u32 %s110_s15, 4  ;;  %s19_s16 = int_to_ptr.vmem [resolvable:$true] %s18_s16 }
   0x3   :  { %21 = dma.hbm_to_vmem [thread:$0]  %s17_s14, 64, %s19_s16, [#allocation5]  }
   0x4   :  { %106 = dma.done.wait [#allocation5], 64  }
   0x5   :  { %107 = vsyncadd [#allocation5], 4294967232  ;;  %v29_v0 = vld [vmem:[%s143_s2] sm:$0x3]  ;;  %vm34_vm0 = vcmask 1041408   ;;  %s111_s18 = smov [#allocation7]  }
   0x6   :  { %v31_v1 = vperm.slane %v29_v0, 0  ;;  %v32_v2 = vperm.slane %v29_v0, 1  ;;  %v28_v3 = vld [vmem:[#allocation4] sm:$0xf]  ;;  %s44_s19 = sshll.u32 %s111_s18, 4  ;;  %s46_s21 = sshll.u32 %s144_s3, 4  ;;  %s45_s19 = int_to_ptr.vmem [resolvable:$true] %s44_s19  ;;  %s47_s21 = int_to_ptr.hbm [resolvable:$true] %s46_s21 }
   0x8   :  { %v33_v4 = vrot.slane %v32_v2, 6 }
   0xa   :  { %v35_v5 = vsel %vm34_vm0, %v31_v1, %v33_v4 }
   0xb   :  { %v37_v6 = vadd.f32 %v35_v5, %v28_v3 }
   0xd   :  { %38 = vst [vmem:[#allocation7] sm:$0xf] %v37_v6 }
   0xe   :  { %49 = dma.vmem_to_hbm [thread:$0]  %s45_s19, 64, %s47_s21, [#allocation6]  }
   0xf   :  { %108 = dma.done.wait [#allocation6], 64  }
  0x10   :  { %109 = vsyncadd [#allocation6], 4294967232 }
  0x11   :  { %54 = vsyncpa [#allocation5], 1 }
  0x12   :  { %55 = vsyncpa [#allocation6], 1 }

</bundles_post_ra>
